<compile_context>
chip_gen: v7x
topology: tpu7x:2x2x1
jax: 0.10.0
libtpu: 0.0.40
codegen_flags: <defaults>
</compile_context>

<pallas_src>
from functools import partial

import numpy as np
import jax
import jax.numpy as jnp
from jax import lax
from jax.experimental import pallas as pl
from jax.experimental.pallas import tpu as pltpu


# --------------------------- layout glue (trace time) ------------------------
def _get_ts_axis(y_pred_shape, y_true_shape):
    # Mirrors the torch heuristic exactly (including the Ts==Ny ambiguity).
    y_pred_shape = tuple(y_pred_shape)[1:]
    y_true_shape = tuple(y_true_shape)[1:]
    ts_axis = -1
    for i, s in enumerate(y_pred_shape):
        if s not in y_true_shape:
            ts_axis = i + 1
            break
    return ts_axis


def _canonicalize(y_pred, y_true, n_ts):
    """Return quantile-major y_pred [B, Ts*Ny] and y_true [B, Ny] with as few
    real data movements as possible (reshapes of contiguous arrays are free)."""
    B = y_true.shape[0]
    yp = y_pred
    # _reshape_y_pred (only for the [B, Ts*Ny] / [B, Ny] case, like the reference)
    if yp.ndim == 2 and y_true.ndim == 2:
        if yp.shape[1] != n_ts * y_true.shape[1]:
            raise ValueError(
                f"y_pred.shape[1]={yp.shape[1]} != n_ts*y_true.shape[1]="
                f"{n_ts}*{y_true.shape[1]}")
        yp = yp.reshape(B, n_ts, y_true.shape[1])          # free row-major reshape
    ts_axis = _get_ts_axis(yp.shape, y_true.shape)
    if ts_axis == -1:
        ts_axis = yp.ndim - 1                              # torch: moveaxis(-1, 0)
    if yp.ndim == 2:
        yp = yp[:, :, None]                                # y_true is 1-D: [B, Ts] -> [B, Ts, 1]
    elif ts_axis != 1:
        # TODO(synk): [B, Ny, Ts]-style layouts need one real HBM transpose; unavoidable.
        yp = jnp.moveaxis(yp, ts_axis, 1)
    yp2 = yp.reshape(B, -1)                                # quantile-major [B, Ts*Ny]
    yt2 = y_true.reshape(B, -1)                            # [B, Ny]
    return yp2, yt2


# ----------------------- generation-aware VMEM / tiling -----------------------
_VMEM_CONFIG = None


def _vmem_config():
    """(vmem_limit_bytes, tile_budget_bytes) chosen per TPU generation."""
    global _VMEM_CONFIG
    if _VMEM_CONFIG is None:
        try:
            cap = int(pltpu.get_tpu_info().vmem_capacity_bytes)
        except Exception:
            cap = 64 * 1024 * 1024                          # conservative (v7x-sized)
        if cap >= 128 * 1024 * 1024:                        # v5e / v6e: 128 MiB physical
            limit = 96 * 1024 * 1024
        else:                                               # v7x: 64 MiB physical
            limit = min(cap // 2, 32 * 1024 * 1024)
        _VMEM_CONFIG = (limit, int(limit * 0.7))            # headroom for misc scratch
    return _VMEM_CONFIG


def _ceil_to(x, m):
    return -(-x // m) * m


def _pick_tile_b(batch, f, ny, yp_isz, yt_isz, vmem_budget):
    """Batch-tile rows: size by bytes (lane-padded VMEM footprint), round to 32
    rows for sub-32-bit sublane packing, keep >=2 grid tiles for large B."""
    f_pad = _ceil_to(f, 128)
    ny_pad = _ceil_to(ny, 128)
    bytes_per_row = (2 * f_pad * yp_isz        # double-buffered y_pred tile
                     + 2 * ny_pad * yt_isz     # double-buffered y_true tile
                     + 5 * ny_pad * 4)         # live f32 (tile_b, Ny) temporaries
    tile = int(vmem_budget // max(bytes_per_row, 1))
    tile = max(32, (tile // 32) * 32)
    if batch >= 64:
        # v7x megacore: make sure both TensorCores get at least one tile.
        tile = min(tile, _ceil_to(_ceil_to(batch, 2) // 2, 32))
    if tile >= batch:
        return batch                            # single block == full array (no mask needed)
    return tile


# ------------------------------- Pallas kernel --------------------------------
def _make_asym_kernel(n_ts, ny, coeffs, batch, tile_b, ragged):
    """yp_ref: [tile_b, Ts*Ny] (native dtype, quantile-major)
       yt_ref: [tile_b, Ny]    (native dtype)
       out_ref:[1, 1, 128] f32 per-tile partial sum (broadcast)."""

    def kernel(yp_ref, yt_ref, out_ref):
        yt = yt_ref[...].astype(jnp.float32)                               # (tile_b, Ny)
        # Ts-unrolled accumulation; temporaries stay (tile_b, Ny) f32.
        acc = coeffs[0] * jnp.abs(yt - yp_ref[:, 0:ny].astype(jnp.float32))
        for q in range(1, n_ts):
            ypq = yp_ref[:, q * ny:(q + 1) * ny].astype(jnp.float32)
            acc = acc + coeffs[q] * jnp.abs(yt - ypq)
        if ragged:
            # Final tile extends past B: rows >= B hold unspecified data -> zero them.
            row = (pl.program_id(0) * tile_b
                   + lax.broadcasted_iota(jnp.int32, acc.shape, 0))
            acc = jnp.where(row < batch, acc, 0.0)
        out_ref[...] = jnp.full(out_ref.shape, jnp.sum(acc), dtype=jnp.float32)

    return kernel


# -------------------------------- JAX wrapper ---------------------------------
@partial(jax.jit, static_argnames=("ts",))
def _asymmetric_losses_impl(y_pred, y_true, ts):
    n_ts = len(ts)
    yp2, yt2 = _canonicalize(y_pred, y_true, n_ts)          # [B, F], [B, Ny]
    B, F = yp2.shape
    Ny = yt2.shape[1]
    if F != n_ts * Ny:
        raise ValueError(f"flattened y_pred width {F} != n_ts*Ny = {n_ts}*{Ny}")

    coeffs = tuple(max(float(t), 1.0 - float(t)) for t in ts)  # max(t,1-t), |err|>=0

    vmem_limit, vmem_budget = _vmem_config()
    yp_isz = jnp.dtype(yp2.dtype).itemsize
    yt_isz = jnp.dtype(yt2.dtype).itemsize
    tile_b = _pick_tile_b(B, F, Ny, yp_isz, yt_isz, vmem_budget)
    num_tiles = -(-B // tile_b)
    ragged = (B % tile_b) != 0

    kernel = _make_asym_kernel(n_ts, Ny, coeffs, B, tile_b, ragged)

    partials = pl.pallas_call(
        kernel,
        out_shape=jax.ShapeDtypeStruct((num_tiles, 1, 128), jnp.float32),
        grid=(num_tiles,),
        in_specs=[
            pl.BlockSpec((tile_b, F), lambda i: (i, 0)),     # contiguous y_pred stream
            pl.BlockSpec((tile_b, Ny), lambda i: (i, 0)),    # y_true tile
        ],
        out_specs=pl.BlockSpec((1, 1, 128), lambda i: (i, 0, 0)),
        compiler_params=pltpu.CompilerParams(
            dimension_semantics=("parallel",),               # independent tiles (2 TCs on v7x)
            vmem_limit_bytes=vmem_limit,
        ),
    )(yp2, yt2)

    total = jnp.sum(partials[:, 0, 0])
    return total / jnp.float32(B * Ny * n_ts)


def asymmetric_losses(y_pred, y_true, ts):
    """JAX/Pallas equivalent of AsymmetricLosses(ts=ts, loss=LNErrors(1)).forward."""
    if isinstance(ts, int):
        ts = np.linspace(1.0 / (ts * 2), 1.0 - 1.0 / (ts * 2), ts)
    ts = tuple(float(t) for t in np.asarray(ts).reshape(-1))
    return _asymmetric_losses_impl(jnp.asarray(y_pred), jnp.asarray(y_true), ts=ts)


# --------------------------------- reference ----------------------------------
def _numpy_reference(y_pred, y_true, ts):
    y_pred = np.asarray(y_pred, np.float64)
    y_true = np.asarray(y_true, np.float64)
    n_ts = len(ts)
    if y_pred.ndim == 2 and y_true.ndim == 2:
        y_pred = y_pred.reshape(y_pred.shape[0], n_ts, -1)
    ts_axis = _get_ts_axis(y_pred.shape, y_true.shape)
    y_pred = np.moveaxis(y_pred, ts_axis, 0)
    losses = []
    for q, t in enumerate(ts):
        err = np.abs(y_true - y_pred[q])
        losses.append(np.mean(np.maximum(t * err, (1.0 - t) * err)))
    return float(np.mean(losses))


# ------------------------------------ main -------------------------------------
if __name__ == "__main__":
    n_q = 5
    ts = np.linspace(1.0 / (n_q * 2), 1.0 - 1.0 / (n_q * 2), n_q)

    key = jax.random.PRNGKey(0)
    keys = jax.random.split(key, 8)

    # Case 1: y_pred [B, Ts*Ny] flat quantile-major, y_true [B, Ny]
    B, Ny = 8, 4
    yp = jax.random.normal(keys[0], (B, n_q * Ny), dtype=jnp.float32)
    yt = jax.random.normal(keys[1], (B, Ny), dtype=jnp.float32)
    out = jax.block_until_ready(asymmetric_losses(yp, yt, ts))
    np.testing.assert_allclose(np.asarray(out), _numpy_reference(yp, yt, ts),
                               rtol=1e-5, atol=1e-6)

    # Case 2: y_pred [B, Ts, Ny] with ragged B (single tile, block > B -> full-array block)
    B2, Ny2 = 20, 4
    yp2 = jax.random.normal(keys[2], (B2, n_q, Ny2), dtype=jnp.float32)
    yt2 = jax.random.normal(keys[3], (B2, Ny2), dtype=jnp.float32)
    out2 = jax.block_until_ready(asymmetric_losses(yp2, yt2, ts))
    np.testing.assert_allclose(np.asarray(out2), _numpy_reference(yp2, yt2, ts),
                               rtol=1e-5, atol=1e-6)

    # Case 3: larger ragged batch -> multi-tile "parallel" grid + in-kernel row mask
    B3, Ny3, n_q3 = 100, 3, 7
    ts3 = np.linspace(1.0 / (n_q3 * 2), 1.0 - 1.0 / (n_q3 * 2), n_q3)
    yp3 = jax.random.normal(keys[4], (B3, n_q3 * Ny3), dtype=jnp.float32)
    yt3 = jax.random.normal(keys[5], (B3, Ny3), dtype=jnp.float32)
    out3 = jax.block_until_ready(asymmetric_losses(yp3, yt3, ts3))
    np.testing.assert_allclose(np.asarray(out3), _numpy_reference(yp3, yt3, ts3),
                               rtol=1e-5, atol=1e-6)

    # Case 4: 1-D y_true [B] with y_pred [B, Ts]
    B4 = 16
    yp4 = jax.random.normal(keys[6], (B4, n_q), dtype=jnp.float32)
    yt4 = jax.random.normal(keys[7], (B4,), dtype=jnp.float32)
    out4 = jax.block_until_ready(asymmetric_losses(yp4, yt4, ts))
    np.testing.assert_allclose(np.asarray(out4), _numpy_reference(yp4, yt4, ts),
                               rtol=1e-5, atol=1e-6)

    print("KERNEL_OK")
</pallas_src>

<mosaic_0001>
module attributes {stable_mosaic.version = 11 : i64} {
  func.func @kernel(%arg0: i32, %arg1: memref<8x20xf32, #tpu.memory_space<vmem>>, %arg2: memref<8x4xf32, #tpu.memory_space<vmem>>, %arg3: memref<1x1x128xf32, #tpu.memory_space<vmem>>) attributes {dimension_semantics = [#tpu.dimension_semantics<parallel>], iteration_bounds = array<i64: 1>, scalar_prefetch = 0 : i64, scratch_operands = 0 : i64, tpu.core_type = #tpu.core_type<tc>, window_params = [{transform_indices = @transform_0, window_bounds = array<i64: 8, 20>}, {transform_indices = @transform_1, window_bounds = array<i64: 8, 4>}, {transform_indices = @transform_2, window_bounds = array<i64: 1, 1, 128>}]} {
    %c0 = arith.constant 0 : index
    %c0_0 = arith.constant 0 : index
    %0 = vector.load %arg2[%c0, %c0_0] : memref<8x4xf32, #tpu.memory_space<vmem>>, vector<8x4xf32>
    %c0_1 = arith.constant 0 : index
    %c0_2 = arith.constant 0 : index
    %1 = vector.load %arg1[%c0_1, %c0_2] : memref<8x20xf32, #tpu.memory_space<vmem>>, vector<8x4xf32>
    %2 = arith.subf %0, %1 : vector<8x4xf32>
    %3 = math.absf %2 : vector<8x4xf32>
    %cst = arith.constant 0.899999976 : f32
    %4 = vector.broadcast %cst : f32 to vector<8x4xf32>
    %5 = arith.mulf %4, %3 : vector<8x4xf32>
    %c0_3 = arith.constant 0 : index
    %c4 = arith.constant 4 : index
    %6 = vector.load %arg1[%c0_3, %c4] : memref<8x20xf32, #tpu.memory_space<vmem>>, vector<8x4xf32>
    %7 = arith.subf %0, %6 : vector<8x4xf32>
    %8 = math.absf %7 : vector<8x4xf32>
    %cst_4 = arith.constant 0.699999988 : f32
    %9 = vector.broadcast %cst_4 : f32 to vector<8x4xf32>
    %10 = arith.mulf %9, %8 : vector<8x4xf32>
    %11 = arith.addf %5, %10 : vector<8x4xf32>
    %c0_5 = arith.constant 0 : index
    %c8 = arith.constant 8 : index
    %12 = vector.load %arg1[%c0_5, %c8] : memref<8x20xf32, #tpu.memory_space<vmem>>, vector<8x4xf32>
    %13 = arith.subf %0, %12 : vector<8x4xf32>
    %14 = math.absf %13 : vector<8x4xf32>
    %cst_6 = arith.constant 5.000000e-01 : f32
    %15 = vector.broadcast %cst_6 : f32 to vector<8x4xf32>
    %16 = arith.mulf %15, %14 : vector<8x4xf32>
    %17 = arith.addf %11, %16 : vector<8x4xf32>
    %c0_7 = arith.constant 0 : index
    %c12 = arith.constant 12 : index
    %18 = vector.load %arg1[%c0_7, %c12] : memref<8x20xf32, #tpu.memory_space<vmem>>, vector<8x4xf32>
    %19 = arith.subf %0, %18 : vector<8x4xf32>
    %20 = math.absf %19 : vector<8x4xf32>
    %cst_8 = arith.constant 0.699999988 : f32
    %21 = vector.broadcast %cst_8 : f32 to vector<8x4xf32>
    %22 = arith.mulf %21, %20 : vector<8x4xf32>
    %23 = arith.addf %17, %22 : vector<8x4xf32>
    %c0_9 = arith.constant 0 : index
    %c16 = arith.constant 16 : index
    %24 = vector.load %arg1[%c0_9, %c16] : memref<8x20xf32, #tpu.memory_space<vmem>>, vector<8x4xf32>
    %25 = arith.subf %0, %24 : vector<8x4xf32>
    %26 = math.absf %25 : vector<8x4xf32>
    %cst_10 = arith.constant 0.899999976 : f32
    %27 = vector.broadcast %cst_10 : f32 to vector<8x4xf32>
    %28 = arith.mulf %27, %26 : vector<8x4xf32>
    %29 = arith.addf %23, %28 : vector<8x4xf32>
    %30 = vector.shape_cast %29 : vector<8x4xf32> to vector<1x8x4xf32>
    %cst_11 = arith.constant dense<0.000000e+00> : vector<1xf32>
    %31 = vector.multi_reduction <add>, %30, %cst_11 [1, 2] : vector<1x8x4xf32> to vector<1xf32>
    %32 = vector.shape_cast %31 : vector<1xf32> to vector<1x1x1xf32>
    %33 = vector.extract %32[0, 0, 0] : f32 from vector<1x1x1xf32>
    %34 = vector.broadcast %33 : f32 to vector<1x1x128xf32>
    %c0_12 = arith.constant 0 : index
    %c0_13 = arith.constant 0 : index
    %c0_14 = arith.constant 0 : index
    %35 = vector.load %arg3[%c0_12, %c0_13, %c0_14] : memref<1x1x128xf32, #tpu.memory_space<vmem>>, vector<1x1x128xf32>
    tpu.vector_store %arg3[%c0_12, %c0_13, %c0_14], %34 {strides = array<i32>} : memref<1x1x128xf32, #tpu.memory_space<vmem>>, vector<1x1x128xf32>,
    return
  }
  func.func @transform_0(%arg0: i32) -> (i32, i32) {
    %c0_i32 = arith.constant 0 : i32
    %c0_i32_0 = arith.constant 0 : i32
    return %arg0, %c0_i32 : i32, i32
  }
  func.func @transform_1(%arg0: i32) -> (i32, i32) {
    %c0_i32 = arith.constant 0 : i32
    %c0_i32_0 = arith.constant 0 : i32
    return %arg0, %c0_i32 : i32, i32
  }
  func.func @transform_2(%arg0: i32) -> (i32, i32, i32) {
    %c0_i32 = arith.constant 0 : i32
    %c0_i32_0 = arith.constant 0 : i32
    %c0_i32_1 = arith.constant 0 : i32
    return %arg0, %c0_i32, %c0_i32_0 : i32, i32, i32
  }
}

</mosaic_0001>

<bundles_post_ra>
// kernel: _asymmetric_losses_impl.1
= control target key start
LH: loop header
LB: loop body
LE: loop exit
PB: predicated region body
PF: predicated region fallthrough
CT: control target
= control target key end

     0   :  { %s68_s11 = smov 124   ;;  %s69_s12 = smov 116   ;;  %vm45_vm0 = vcmask 31744   ;;  %s96_s0 = inlined_call_operand.vmem [shape: f32[8,20], index: 0, kind: input, shape index: {}]   ;;  %s97_s1 = inlined_call_operand.vmem [shape: f32[8,4], index: 1, kind: input, shape index: {}]   ;;  %s98_s2 = inlined_call_operand.vmem [shape: f32[1,1,128], index: 2, kind: output, shape index: {}]  }
   0x1   :  { %v12_v0 = vld [vmem:[%s96_s0] sm:$0xff]  ;;  %s70_s13 = smov 120   ;;  %s71_s14 = smov 112  }
   0x2   :  { %17 = vrot.lane.b32.xlu0 %v12_v0, %s68_s11  ;;  %31 = vrot.lane.b32.xlu1 %v12_v0, %s69_s12  ;;  %v11_v1 = vld [vmem:[%s97_s1] sm:$0xff] }
   0x3   :  { %v13_v2 = vsub.f32 %v11_v1, %v12_v0 }
   0x5   :  { %v14_v5 = vand.u32 2147483647, %v13_v2 }
   0x6   :  { %24 = vrot.lane.b32.xlu0 %v12_v0, %s70_s13  ;;  %38 = vrot.lane.b32.xlu1 %v12_v0, %s71_s14 }
   0x7   :  { %v15_v11 = vmul.f32 0.9, %v14_v5 }
  0x74   :  { %v18_v3 = vpop.permute.xlu0 %17  ;;  %v32_v4 = vpop.permute.xlu1 %31 }
  0x75   :  { %v20_v6 = vsub.f32 %v11_v1, %v18_v3  ;;  %v34_v8 = vsub.f32 %v11_v1, %v32_v4 }
  0x77   :  { %v21_v7 = vand.u32 2147483647, %v20_v6  ;;  %v35_v15 = vand.u32 2147483647, %v34_v8 }
  0x78   :  { %v25_v9 = vpop.permute.xlu0 %24  ;;  %v39_v10 = vpop.permute.xlu1 %38 }
  0x79   :  { %v22_v12 = vmul.f32 0.7, %v21_v7  ;;  %v27_v13 = vsub.f32 %v11_v1, %v25_v9  ;;  %v41_v14 = vsub.f32 %v11_v1, %v39_v10  ;;  %v36_v20 = vmul.f32 0.7, %v35_v15 }
  0x7b   :  { %v28_v16 = vand.u32 2147483647, %v27_v13  ;;  %v42_v17 = vand.u32 2147483647, %v41_v14  ;;  %v23_v18 = vadd.f32 %v22_v12, %v15_v11 }
  0x7d   :  { %v29_v19 = vmul.f32 0.5, %v28_v16  ;;  %v43_v22 = vmul.f32 0.9, %v42_v17 }
  0x7f   :  { %v30_v21 = vadd.f32 %v29_v19, %v23_v18 }
  0x81   :  { %v37_v23 = vadd.f32 %v36_v20, %v30_v21 }
  0x83   :  { %v44_v24 = vadd.f32 %v43_v22, %v37_v23 }
  0x85   :  { %v46_v25 = vsel %vm45_vm0, %v44_v24, 0.0 }
  0x86   :  { %47 = vadd.xlane.f32.xlu0 %v46_v25 }
 0x113   :  { %v48_v26 = vpop.xlane.xlu0 %47 }
 0x114   :  { %v49_v27 = vrot.slane %v48_v26, 4 }
 0x116   :  { %v50_v28 = vadd.f32 %v49_v27, %v48_v26 }
 0x118   :  { %v51_v29 = vrot.slane %v50_v28, 2 }
 0x11a   :  { %v52_v30 = vadd.f32 %v51_v29, %v50_v28 }
 0x11c   :  { %v53_v31 = vrot.slane %v52_v30, 1 }
 0x11e   :  { %v54_v32 = vadd.f32 %v53_v31, %v52_v30 }
 0x120   :  { %62 = vpush %v54_v32 }
 0x151   :  { %s63_s0 = spop %62 }
 0x152   :  { %v56_v33 = vstv %s63_s0 }
 0x153   :  { %57 = vst [vmem:[%s98_s2] sm:$0x1] %v56_v33 }

</bundles_post_ra>
